<compile_context>
chip_gen: v7x
topology: tpu7x:2x2x1
jax: 0.10.0
libtpu: 0.0.40
codegen_flags: <defaults>
</compile_context>

<pallas_src>
import math

import jax
import jax.numpy as jnp
from jax.experimental import pallas as pl
from jax.experimental.pallas import tpu as pltpu


def _mlp_kernel(x_ref, w1_ref, b1_ref, w2t_ref, b2_ref, o_ref):
    # x: (TM, D)  w1: (D, H)  b1: (1, H)  w2t: (2, H)  b2: (1, 2)  o: (TM, 2)
    x = x_ref[...]
    # First (dominant) matmul on the MXU with an f32 accumulator.
    # NOTE: default precision of an f32 x f32 MXU matmul; the 1e-5 reference
    # check below passes — revisit precision only if bit-closeness at large D
    # becomes a requirement.
    h = jnp.dot(x, w1_ref[...], preferred_element_type=jnp.float32)
    h = jnp.maximum(h + b1_ref[...], 0.0)  # bias + ReLU (VPU)

    # Second "matmul" has only 2 output columns -> do it on the VPU/XLU
    # (elementwise multiply + lane reduction) instead of the MXU.
    w2t = w2t_ref[...]                                        # (2, H)
    o0 = jnp.sum(h * w2t[0, :], axis=-1, keepdims=True)       # (TM, 1)
    o1 = jnp.sum(h * w2t[1, :], axis=-1, keepdims=True)       # (TM, 1)
    o = jnp.concatenate([o0, o1], axis=-1) + b2_ref[...]      # (TM, 2)
    o_ref[...] = o.astype(o_ref.dtype)


def _vmem_budget():
    """Generation-aware (per-x-buffer bytes, vmem_limit_bytes)."""
    try:
        cap = getattr(pltpu.get_tpu_info(), "vmem_capacity_bytes", None)
    except Exception:  # pragma: no cover - query unavailable
        cap = None
    if cap is not None and cap >= 100 * 1024 * 1024:
        # v5e / v6e: 128 MiB physical VMEM -> big tiles, fewer grid steps.
        return 16 * 1024 * 1024, 64 * 1024 * 1024
    # v7x (64 MiB per TensorCore) or unknown: keep the double-buffered x tile
    # + resident weights comfortably inside the budget.
    return 10 * 1024 * 1024, 48 * 1024 * 1024


def _choose_tm(n_rows, d, per_buf_bytes, min_blocks=4):
    """Row tile: sized by bytes (HBM-bound), but capped so the grid keeps at
    least `min_blocks` steps (pipeline overlap; 2-TC sharding on v7x)."""
    row_bytes = 4 * max(d, 1)
    tm_bytes = max(8, (per_buf_bytes // row_bytes) // 8 * 8)
    # Don't let one tile swallow the whole problem: keep a few grid steps.
    tm_split = max(8, ((-(-n_rows // min_blocks)) + 7) // 8 * 8)
    return max(8, min(tm_bytes, tm_split))


def labeller_forward(x, w1, b1, w2, b2):
    """x: (S, B, D) float32 -> (B, S, 2) float32 (matches Labeller.forward)."""
    S, B, D = x.shape
    H = w1.shape[1]
    N = S * B

    per_buf_bytes, vmem_limit = _vmem_budget()
    TM = _choose_tm(N, D, per_buf_bytes)
    n_blocks = pl.cdiv(N, TM)

    # No padding copy: the ragged last block (if any) is handled by Pallas —
    # OOB input rows are undefined but their output writes are masked/dropped.
    x2d = x.reshape(N, D)
    b1_2d = b1.reshape(1, H)
    w2t = w2.T                      # (2, H) so the kernel reads rows lane-dense
    b2_2d = b2.reshape(1, 2)

    flops = 2 * N * D * H + 6 * N * H
    bytes_accessed = 4 * (N * D + D * H + 3 * H + 2 + N * 2)

    out2d = pl.pallas_call(
        _mlp_kernel,
        out_shape=jax.ShapeDtypeStruct((N, 2), jnp.float32),
        grid=(n_blocks,),
        in_specs=[
            pl.BlockSpec((TM, D), lambda i: (i, 0)),   # x tile (auto-pipelined)
            pl.BlockSpec((D, H), lambda i: (0, 0)),    # weights stay resident
            pl.BlockSpec((1, H), lambda i: (0, 0)),
            pl.BlockSpec((2, H), lambda i: (0, 0)),
            pl.BlockSpec((1, 2), lambda i: (0, 0)),
        ],
        out_specs=pl.BlockSpec((TM, 2), lambda i: (i, 0)),
        compiler_params=pltpu.CompilerParams(
            dimension_semantics=("parallel",),          # 2-TC sharding on v7x
            vmem_limit_bytes=vmem_limit,                # generation-aware budget
        ),
        cost_estimate=pl.CostEstimate(
            flops=flops, transcendentals=0, bytes_accessed=bytes_accessed),
    )(x2d, w1, b1_2d, w2t, b2_2d)

    # (S*B, 2) -> (S, B, 2) -> permute(1, 0, 2) -> (B, S, 2). Touches only
    # N*8 bytes, so it stays in plain JAX.
    return out2d.reshape(S, B, 2).transpose(1, 0, 2)


def init_labeller_params(key, input_dim):
    """Deterministic init mirroring nn.Linear default (uniform +-1/sqrt(fan_in))."""
    hidden_dim = round(2 * (input_dim / 2) ** 0.5)
    k1, k2, k3, k4 = jax.random.split(key, 4)
    lim1 = 1.0 / math.sqrt(input_dim)
    lim2 = 1.0 / math.sqrt(hidden_dim)
    # Stored already transposed relative to torch's (out, in) so the kernel
    # computes x @ W directly.
    w1 = jax.random.uniform(k1, (input_dim, hidden_dim), jnp.float32, -lim1, lim1)
    b1 = jax.random.uniform(k2, (hidden_dim,), jnp.float32, -lim1, lim1)
    w2 = jax.random.uniform(k3, (hidden_dim, 2), jnp.float32, -lim2, lim2)
    b2 = jax.random.uniform(k4, (2,), jnp.float32, -lim2, lim2)
    return w1, b1, w2, b2


if __name__ == "__main__":
    key = jax.random.PRNGKey(0)
    k_x, k_p = jax.random.split(key)

    input_dim = 32            # -> hidden_dim = round(2 * sqrt(16)) = 8
    seq, batch = 8, 2         # input_embedding: (S, B, D)

    x = jax.random.normal(k_x, (seq, batch, input_dim), jnp.float32)
    w1, b1, w2, b2 = init_labeller_params(k_p, input_dim)

    out = labeller_forward(x, w1, b1, w2, b2)
    out = jax.block_until_ready(out)

    # Pure-JAX reference check (same eval-mode semantics).
    ref = jnp.maximum(x @ w1 + b1, 0.0) @ w2 + b2     # (S, B, 2)
    ref = ref.transpose(1, 0, 2)                       # (B, S, 2)
    assert out.shape == (batch, seq, 2), out.shape
    assert jnp.allclose(out, ref, atol=1e-5, rtol=1e-5)

    print("KERNEL_OK")
</pallas_src>

<mosaic_0001>
module attributes {stable_mosaic.version = 11 : i64} {
  func.func @_mlp_kernel(%arg0: i32, %arg1: memref<8x32xf32, #tpu.memory_space<vmem>>, %arg2: memref<32x8xf32, #tpu.memory_space<vmem>>, %arg3: memref<1x8xf32, #tpu.memory_space<vmem>>, %arg4: memref<2x8xf32, #tpu.memory_space<vmem>>, %arg5: memref<1x2xf32, #tpu.memory_space<vmem>>, %arg6: memref<8x2xf32, #tpu.memory_space<vmem>>) attributes {dimension_semantics = [#tpu.dimension_semantics<parallel>], iteration_bounds = array<i64: 2>, scalar_prefetch = 0 : i64, scratch_operands = 0 : i64, tpu.core_type = #tpu.core_type<tc>, window_params = [{transform_indices = @transform_0, window_bounds = array<i64: 8, 32>}, {pipeline_mode = #tpu.pipeline_mode<synchronous>, transform_indices = @transform_1, window_bounds = array<i64: 32, 8>}, {pipeline_mode = #tpu.pipeline_mode<synchronous>, transform_indices = @transform_2, window_bounds = array<i64: 1, 8>}, {pipeline_mode = #tpu.pipeline_mode<synchronous>, transform_indices = @transform_3, window_bounds = array<i64: 2, 8>}, {pipeline_mode = #tpu.pipeline_mode<synchronous>, transform_indices = @transform_4, window_bounds = array<i64: 1, 2>}, {transform_indices = @transform_5, window_bounds = array<i64: 8, 2>}]} {
    %c0 = arith.constant 0 : index
    %c0_0 = arith.constant 0 : index
    %0 = vector.load %arg1[%c0, %c0_0] : memref<8x32xf32, #tpu.memory_space<vmem>>, vector<8x32xf32>
    %c0_1 = arith.constant 0 : index
    %c0_2 = arith.constant 0 : index
    %1 = vector.load %arg2[%c0_1, %c0_2] : memref<32x8xf32, #tpu.memory_space<vmem>>, vector<32x8xf32>
    %cst = arith.constant dense<0.000000e+00> : vector<8x8xf32>
    %2 = tpu.matmul %0, %1, %cst {dimension_numbers = #tpu.dot_dimension_numbers<[1], [0], [0], [1], [0, 0, 1, 1], [], []>} : vector<8x32xf32>, vector<32x8xf32>, vector<8x8xf32> -> vector<8x8xf32>
    %c0_3 = arith.constant 0 : index
    %c0_4 = arith.constant 0 : index
    %3 = vector.load %arg3[%c0_3, %c0_4] : memref<1x8xf32, #tpu.memory_space<vmem>>, vector<1x8xf32>
    %4 = vector.broadcast %3 : vector<1x8xf32> to vector<8x8xf32>
    %5 = arith.addf %2, %4 : vector<8x8xf32>
    %cst_5 = arith.constant 0.000000e+00 : f32
    %6 = vector.broadcast %cst_5 : f32 to vector<8x8xf32>
    %7 = arith.maximumf %5, %6 : vector<8x8xf32>
    %c0_6 = arith.constant 0 : index
    %c0_7 = arith.constant 0 : index
    %8 = vector.load %arg4[%c0_6, %c0_7] : memref<2x8xf32, #tpu.memory_space<vmem>>, vector<2x8xf32>
    %9 = vector.extract_strided_slice %8 {offsets = [0, 0], sizes = [1, 8], strides = [1, 1]} : vector<2x8xf32> to vector<1x8xf32>
    %10 = vector.shape_cast %9 : vector<1x8xf32> to vector<8xf32>
    %11 = vector.shape_cast %10 : vector<8xf32> to vector<1x8xf32>
    %12 = vector.broadcast %11 : vector<1x8xf32> to vector<8x8xf32>
    %13 = arith.mulf %7, %12 : vector<8x8xf32>
    %cst_8 = arith.constant dense<0.000000e+00> : vector<8xf32>
    %14 = vector.multi_reduction <add>, %13, %cst_8 [1] : vector<8x8xf32> to vector<8xf32>
    %15 = vector.shape_cast %14 : vector<8xf32> to vector<8x1xf32>
    %16 = vector.extract_strided_slice %8 {offsets = [1, 0], sizes = [1, 8], strides = [1, 1]} : vector<2x8xf32> to vector<1x8xf32>
    %17 = vector.shape_cast %16 : vector<1x8xf32> to vector<8xf32>
    %18 = vector.shape_cast %17 : vector<8xf32> to vector<1x8xf32>
    %19 = vector.broadcast %18 : vector<1x8xf32> to vector<8x8xf32>
    %20 = arith.mulf %7, %19 : vector<8x8xf32>
    %cst_9 = arith.constant dense<0.000000e+00> : vector<8xf32>
    %21 = vector.multi_reduction <add>, %20, %cst_9 [1] : vector<8x8xf32> to vector<8xf32>
    %22 = vector.shape_cast %21 : vector<8xf32> to vector<8x1xf32>
    %23 = tpu.concatenate %15, %22 in 1 : vector<8x1xf32>, vector<8x1xf32> -> vector<8x2xf32>
    %c0_10 = arith.constant 0 : index
    %c0_11 = arith.constant 0 : index
    %24 = vector.load %arg5[%c0_10, %c0_11] : memref<1x2xf32, #tpu.memory_space<vmem>>, vector<1x2xf32>
    %25 = vector.broadcast %24 : vector<1x2xf32> to vector<8x2xf32>
    %26 = arith.addf %23, %25 : vector<8x2xf32>
    %c0_12 = arith.constant 0 : index
    %c0_13 = arith.constant 0 : index
    %27 = vector.load %arg6[%c0_12, %c0_13] : memref<8x2xf32, #tpu.memory_space<vmem>>, vector<8x2xf32>
    tpu.vector_store %arg6[%c0_12, %c0_13], %26 {strides = array<i32>} : memref<8x2xf32, #tpu.memory_space<vmem>>, vector<8x2xf32>,
    return
  }
  func.func @transform_0(%arg0: i32) -> (i32, i32) {
    %c0_i32 = arith.constant 0 : i32
    %c0_i32_0 = arith.constant 0 : i32
    return %arg0, %c0_i32 : i32, i32
  }
  func.func @transform_1(%arg0: i32) -> (i32, i32) {
    %c0_i32 = arith.constant 0 : i32
    %c0_i32_0 = arith.constant 0 : i32
    %c0_i32_1 = arith.constant 0 : i32
    return %c0_i32, %c0_i32_0 : i32, i32
  }
  func.func @transform_2(%arg0: i32) -> (i32, i32) {
    %c0_i32 = arith.constant 0 : i32
    %c0_i32_0 = arith.constant 0 : i32
    %c0_i32_1 = arith.constant 0 : i32
    return %c0_i32, %c0_i32_0 : i32, i32
  }
  func.func @transform_3(%arg0: i32) -> (i32, i32) {
    %c0_i32 = arith.constant 0 : i32
    %c0_i32_0 = arith.constant 0 : i32
    %c0_i32_1 = arith.constant 0 : i32
    return %c0_i32, %c0_i32_0 : i32, i32
  }
  func.func @transform_4(%arg0: i32) -> (i32, i32) {
    %c0_i32 = arith.constant 0 : i32
    %c0_i32_0 = arith.constant 0 : i32
    %c0_i32_1 = arith.constant 0 : i32
    return %c0_i32, %c0_i32_0 : i32, i32
  }
  func.func @transform_5(%arg0: i32) -> (i32, i32) {
    %c0_i32 = arith.constant 0 : i32
    %c0_i32_0 = arith.constant 0 : i32
    return %arg0, %c0_i32 : i32, i32
  }
}

</mosaic_0001>

<bundles_post_ra>
// kernel: tpu_custom_call.1
= control target key start
LH: loop header
LB: loop body
LE: loop exit
PB: predicated region body
PF: predicated region fallthrough
CT: control target
= control target key end

     0   :  { %s476_s18 = smov 0   ;;  %s521_s0 = inlined_call_operand.vmem [shape: f32[16,32], index: 0, kind: input, shape index: {}]   ;;  %s522_s1 = inlined_call_operand.vmem [shape: f32[32,8], index: 1, kind: input, shape index: {}]   ;;  %s523_s2 = inlined_call_operand.vmem [shape: f32[1,8], index: 2, kind: input, shape index: {}]   ;;  %s524_s3 = inlined_call_operand.vmem [shape: f32[2,8], index: 3, kind: input, shape index: {}]   ;;  %s525_s4 = inlined_call_operand.vmem [shape: f32[1,2], index: 4, kind: input, shape index: {}]   ;;  %s526_s5 = inlined_call_operand.vmem [shape: f32[16,2], index: 5, kind: output, shape index: {}]  }
   0x1 LB: > { %s390_s19 = sadd.s32 4294967295, %s441_s18   ;;  %p394_p0 = scmp.ge.s32.totalorder %s441_s18, 1  ;;  %s441_s18 = sphi %s476_s18, %s15_s18  }
   0x2   : > { %p186_p1 = scmp.lt.s32.totalorder %s441_s18, 3 }
   0x4   : > { %p187_p2 = pnand %p394_p0, %p186_p1 }
   0x5   : > { %v221_v0 = vld [vmem:[%s522_s1] sm:$0xff] (!%p187_p2)  ;;  %v222_v1 = vld [vmem:[%s522_s1 + $0x8] sm:$0xff] (!%p187_p2)  ;;  %v223_v2 = vld [vmem:[%s522_s1 + $0x10] sm:$0xff] (!%p187_p2)  ;;  %v443_v3 = vmov (!%p187_p2), 0.0|0.0   ;;  %vm444_vm0 = vmmov (!%p187_p2), 0   ;;  %v445_v6 = vmov (!%p187_p2), 0.0   ;;  %v308_v9 = vlaneseq (!%p187_p2) }
   0x6   : > { %190 = sbr.rel (%p187_p2) target bundleno = 386 (0x182), region = 40  ;;  %418 = vmatprep.subr.bf16.mxu0 (!%p187_p2), %v443_v3  ;;  %v419_v4 = vpack.c.bf16 (!%p187_p2), %v222_v1, %v221_v0  ;;  %v224_v5 = vld [vmem:[%s522_s1 + $0x18] sm:$0xff] (!%p187_p2)  ;;  %415 = vmatprep.mubr.msk.f32.mxu0 (!%p187_p2), %vm444_vm0, %v445_v6  ;;  %p212_p3 = scmp.lt.s32.totalorder (!%p187_p2), %s390_s19, 1  ;;  %vm232_vm1 = vcmask (!%p187_p2), 261120   ;;  %v397_v12 = vld [vmem:[%s523_s2] ss:$0 sm:$0xff] (!%p187_p2) }
   0x7   : > { %v422_v7 = vpack.c.bf16 (!%p187_p2), %v224_v5, %v223_v2  ;;  %v309_v10 = vshrl.u32 (!%p187_p2), %v308_v9, 7  ;;  %v307_v13 = vld [vmem:[%s524_s3] sm:$0x3] (!%p187_p2)  ;;  %vm313_vm2 = vcmask (!%p187_p2), 64512   ;;  %vm325_vm3 = vcmask (!%p187_p2), 7168  }
   0x8   : > { %420 = vmatpush3.bf16.msra.mxu0 (!%p187_p2), %v419_v4  ;;  %v399_v26 = vld [vmem:[%s525_s4] ss:$0 sm:$0xff] (!%p187_p2)  ;;  %vm335_vm4 = vcmask (!%p187_p2), 15360  }
   0x9   : > { %421 = vmatprep.subr.bf16.mxu0 (!%p187_p2), %v443_v3  ;;  %v310_v11 = vsub.s32 (!%p187_p2), 0, %v309_v10  ;;  %v319_v14 = vsub.s32 (!%p187_p2), 1, %v309_v10 }
   0xb   : > { %v311_v18 = vrot.slane (!%p187_p2), %v307_v13, %v310_v11  ;;  %v320_v20 = vrot.slane (!%p187_p2), %v307_v13, %v319_v14 }
   0xc   : > { %423 = vmatpush3.bf16.msra.mxu0 (!%p187_p2), %v422_v7 }
   0xd   : > { %s528_s19 = smov (!%p212_p3, %s390_s19), 1 }
   0xe   : > { %s395_s28 = sshll.u32 %s528_s19, 3 }
   0xf   : > { %s215_s6 = scalar_lea.vmem %s521_s0, %s395_s28  ;;  %s219_s15 = scalar_lea.vmem %s526_s5, %s395_s28 }
  0x10   : > { %v220_v8 = vld [vmem:[%s215_s6] sm:$0xff] }
  0x11   : > { %416 = vmatmul.mubr.msk.f32.vlgmr.msra.gmra.mrb[0].mxu0 %vm232_vm1, %v220_v8 }
  0xe4   : > { %v302_v15 = vpop.f32.mrb[0].mxu0 }
  0xe5   : > { %v303_v16 = vadd.f32 %v397_v12, %v302_v15  ;;  %v417_v17 = vpop.f32.mrb[1].mxu0 }
  0xe7   : > { %v306_v19 = vmax.f32 %v303_v16, 0.0 }
  0xe9   : > { %v312_v21 = vmul.f32 %v311_v18, %v306_v19  ;;  %v321_v23 = vmul.f32 %v320_v20, %v306_v19 }
  0xeb   : > { %v314_v22 = vsel %vm313_vm2, %v312_v21, 0.0  ;;  %v322_v24 = vsel %vm313_vm2, %v321_v23, 0.0 }
  0xec   : > { %315 = vadd.xlane.f32.xlu0 %v314_v22 }
  0xf0   : > { %323 = vadd.xlane.f32.xlu0 %v322_v24 }
 0x179   : > { %v316_v25 = vpop.xlane.xlu0 %315 }
 0x17d   : > { %v324_v27 = vpop.xlane.xlu0 %323 }
 0x17e   : > { %v326_v28 = vsel %vm325_vm3, %v316_v25, %v324_v27 }
 0x17f   : > { %v334_v29 = vadd.f32 %v399_v26, %v326_v28 }
 0x181   : > { %336 = vst.msk [vmem:[%s219_s15] sm:$0xff] %vm335_vm4, %v334_v29 }
 0x182 PF: > { %s15_s18 = sadd.s32 1, %s441_s18  }
 0x183   : > { %p12_p4 = scmp.ge.s32.totalorder %s15_s18, 4  }
 0x185   :  { %14 = sbr.rel (!%p12_p4) target bundleno = 1 (0x1), region = 70 }

</bundles_post_ra>
